<compile_context>
chip_gen: v7x
topology: tpu7x:2x2x1
jax: 0.10.0
libtpu: 0.0.40
codegen_flags: <defaults>
</compile_context>

<pallas_src>
import functools

import numpy as np
import jax
import jax.numpy as jnp
from jax.experimental import pallas as pl
from jax.experimental.pallas import tpu as pltpu


# ---------------------------------------------------------------------------
# Fused token-path kernel: teacher patch-embed + masked token distillation +
# per-batch pooled teacher tokens, streamed over row tiles of the B*N axis.
# ---------------------------------------------------------------------------
def _log_softmax(x):
    m = jnp.max(x, axis=-1, keepdims=True)
    s = x - m
    return s - jnp.log(jnp.sum(jnp.exp(s), axis=-1, keepdims=True))


def _token_path_kernel(x_ref, w_patch_ref, tok_pred_ref, mask_ref,
                       tok_vec_ref, pooled_ref, *,
                       tokens_per_image, tiles_per_split, mse_token):
    i = pl.program_id(0)          # TensorCore split     ("parallel")
    j = pl.program_id(1)          # row tile in split    ("arbitrary")
    hi = jax.lax.Precision.HIGHEST

    tm = tok_pred_ref.shape[0]
    B = pooled_ref.shape[0]

    @pl.when(j == 0)
    def _init():
        tok_vec_ref[...] = jnp.zeros_like(tok_vec_ref)
        pooled_ref[...] = jnp.zeros_like(pooled_ref)

    # Teacher patch embedding for this row tile: bf16 x bf16 -> f32 (MXU).
    token_t = jnp.dot(x_ref[...], w_patch_ref[...],
                      preferred_element_type=jnp.float32)        # (tm, C)
    tp = tok_pred_ref[...].astype(jnp.float32)                   # (tm, C)
    m = mask_ref[...]                                            # (1, tm)
    w_sel = (m > 0.5).astype(jnp.float32)                        # (1, tm)

    # Masked token distillation element-wise term (padded rows have mask 0).
    if mse_token:
        elem = (tp - token_t) ** 2
    else:
        ltp = _log_softmax(tp)
        mt = jnp.max(token_t, axis=-1, keepdims=True)
        st = token_t - mt
        et = jnp.exp(st)                       # exp once; reused for p_t
        zt = jnp.sum(et, axis=-1, keepdims=True)
        ltt = st - jnp.log(zt)                 # log_softmax(token_t)
        pt = et / zt                           # softmax(token_t)
        elem = pt * (ltt - ltp)

    # Masked row reduction as a lane-dense (1, tm) x (tm, C) MXU dot,
    # accumulated as a (1, C) vector (cross-lane sum happens once, in the
    # wrapper).  HIGHEST precision here costs ~1/tm of the main matmul.
    tok_vec_ref[...] = tok_vec_ref[...] + jnp.dot(
        w_sel, elem, preferred_element_type=jnp.float32, precision=hi)

    # Per-batch pooled teacher tokens (for the teacher class head): build the
    # (B, tm) batch-membership one-hot from the global row index -- no HBM
    # traffic, no control flow, one tiny MXU dot.
    row0 = (i * tiles_per_split + j) * tm
    bidx = jax.lax.broadcasted_iota(jnp.int32, (B, tm), 0)
    cidx = row0 + jax.lax.broadcasted_iota(jnp.int32, (B, tm), 1)
    member = jnp.logical_and(cidx >= bidx * tokens_per_image,
                             cidx < (bidx + 1) * tokens_per_image
                             ).astype(jnp.float32)               # (B, tm)
    pooled_ref[...] = pooled_ref[...] + jnp.dot(
        member, token_t, preferred_element_type=jnp.float32, precision=hi)


def dynamicvit_distill_loss(inputs, outputs, labels, *,
                            keep_rate, teacher_params, patch,
                            cls_weight, ratio_weight, cls_distill_weight,
                            token_distill_weight, mse_token,
                            block_rows=1024, num_core_splits=2):
    """DynamicViTDistillationLoss.forward.

    The O(B*N*K*C) teacher/token work is a single Pallas kernel; the
    O(B*num_classes + L*B*N) scalar terms are plain JAX on its partial sums.
    block_rows: token-axis tile (keep <=1024 for ViT-B shapes on v7x's 64 MiB
    VMEM; 1024-2048 fine on v5e/v6e).
    """
    pred, token_pred, mask, out_pred_score = outputs
    B, num_classes = pred.shape
    _, N, C = token_pred.shape
    L = len(out_pred_score)
    assert len(keep_rate) >= L
    assert mask.size == B * N

    w_patch, w_head = teacher_params
    # Teacher runs under torch.no_grad() in the reference module.
    w_patch = jax.lax.stop_gradient(w_patch)
    w_head = jax.lax.stop_gradient(jnp.asarray(w_head, jnp.float32))

    # Patchify NCHW -> (B*N, Cin*p*p).  Cast to bf16 BEFORE the transpose so
    # the XLA copy moves half the bytes (teacher operands are bf16 anyway).
    Bi, Cin, H, W = inputs.shape
    nh, nw = H // patch, W // patch
    assert Bi == B and nh * nw == N
    K = Cin * patch * patch
    x = jax.lax.stop_gradient(inputs).astype(jnp.bfloat16)
    x = x.reshape(B, Cin, nh, patch, nw, patch)
    x = x.transpose(0, 2, 4, 1, 3, 5).reshape(B * N, K)
    w_patch_bf16 = w_patch.astype(jnp.bfloat16)

    # Row tiling of the B*N token axis, split across (up to) 2 core shards.
    M = B * N
    tm = max(8, (min(int(block_rows), M) // 8) * 8)
    if tm >= 256:
        tm = (tm // 256) * 256            # MXU-friendly / lane-dense DMA
    n_tiles = -(-M // tm)
    n_split = max(1, min(int(num_core_splits), n_tiles))
    tiles_per_split = -(-n_tiles // n_split)
    total_tiles = n_split * tiles_per_split
    pad = total_tiles * tm - M

    x_tiles = jnp.pad(x, ((0, pad), (0, 0)))
    # token_pred stays f32 (second-largest stream).
    # TODO(synk): optional bf16 token_pred halves that stream; re-validate KL
    # numerics against the f32 reference before adopting.
    tok_pred_2d = jnp.pad(token_pred.reshape(M, C), ((0, pad), (0, 0)))
    mask_flat = jnp.reshape(mask, (M,)).astype(jnp.float32)
    mask_tiles = jnp.pad(mask_flat, (0, pad)).reshape(total_tiles, 1, tm)

    kernel = functools.partial(
        _token_path_kernel,
        tokens_per_image=int(N),
        tiles_per_split=int(tiles_per_split),
        mse_token=bool(mse_token))

    tok_vec_parts, pooled_parts = pl.pallas_call(
        kernel,
        out_shape=(jax.ShapeDtypeStruct((n_split, 1, C), jnp.float32),
                   jax.ShapeDtypeStruct((n_split, B, C), jnp.float32)),
        grid=(n_split, tiles_per_split),
        in_specs=[
            pl.BlockSpec((tm, K), lambda i, j: (i * tiles_per_split + j, 0)),
            pl.BlockSpec((K, C), lambda i, j: (0, 0)),
            pl.BlockSpec((tm, C), lambda i, j: (i * tiles_per_split + j, 0)),
            pl.BlockSpec((None, 1, tm),
                         lambda i, j: (i * tiles_per_split + j, 0, 0)),
        ],
        out_specs=(
            pl.BlockSpec((None, 1, C), lambda i, j: (i, 0, 0)),
            pl.BlockSpec((None, B, C), lambda i, j: (i, 0, 0)),
        ),
        compiler_params=pltpu.CompilerParams(
            dimension_semantics=("parallel", "arbitrary"),
            # Safe on v5e/v6e/v7x; raise toward 64 MiB on v5e/v6e if
            # block_rows is pushed past ~2048 (v7x physical VMEM is 64 MiB).
            vmem_limit_bytes=32 * 1024 * 1024),
    )(x_tiles, w_patch_bf16, tok_pred_2d, mask_tiles)

    # ---------- tiny epilogue in plain JAX (overlaps with the kernel) -------
    tok_sum = jnp.sum(tok_vec_parts)                    # masked distill sum
    pooled = jnp.sum(pooled_parts, axis=0)              # (B, C) teacher pool
    nsel = jnp.sum((mask_flat > 0.5).astype(jnp.float32))
    msum = jnp.sum(mask_flat)

    pred32 = pred.astype(jnp.float32)
    logp = jax.nn.log_softmax(pred32, axis=-1)
    # base_criterion assumed nn.CrossEntropyLoss() (integer labels, mean).
    labels_i = labels.astype(jnp.int32)
    base_loss = -jnp.mean(jnp.take_along_axis(logp, labels_i[:, None], axis=1))

    cls_t = jax.lax.stop_gradient(pooled / float(N)) @ w_head   # teacher logits
    logq = jax.nn.log_softmax(cls_t, axis=-1)
    cls_kl = jnp.sum(jnp.exp(logq) * (logq - logp)) / B   # batchmean, log_target

    pred_loss = 0.0
    for l in range(L):
        s = out_pred_score[l].astype(jnp.float32)
        pred_loss = pred_loss + jnp.mean(
            (jnp.mean(s, axis=1) - float(keep_rate[l])) ** 2)
    pred_loss = pred_loss / L

    denom = jnp.maximum(nsel, 1.0)
    if mse_token:
        tok_loss = tok_sum / (denom * C)
    else:
        tok_loss = tok_sum / denom
    token_term = jnp.where(msum < 0.1, 0.0, token_distill_weight * tok_loss)

    loss = (cls_weight * base_loss
            + ratio_weight * pred_loss
            + cls_distill_weight * cls_kl
            + token_term)
    return loss


# ---------------------------------------------------------------------------
# Pure numpy reference (mirrors the PyTorch forward).  Teacher evaluated with
# the same bf16-rounded patch-embed operands as the kernel (documented
# intentional deviation from a strict-f32 teacher).
# ---------------------------------------------------------------------------
def reference_teacher(inputs, w_patch, w_head, patch):
    x = np.asarray(inputs, np.float32)
    B, Cin, H, W = x.shape
    nh, nw = H // patch, W // patch
    xp = x.reshape(B, Cin, nh, patch, nw, patch).transpose(0, 2, 4, 1, 3, 5)
    xp = xp.reshape(B * nh * nw, Cin * patch * patch)
    xb = np.asarray(jnp.asarray(xp).astype(jnp.bfloat16).astype(jnp.float32))
    wb = np.asarray(jnp.asarray(w_patch).astype(jnp.bfloat16).astype(jnp.float32))
    token_t = (xb @ wb).reshape(B, nh * nw, -1)
    cls_t = token_t.mean(axis=1) @ np.asarray(w_head, np.float32)
    return cls_t.astype(np.float32), token_t.astype(np.float32)


def reference_loss(pred, labels, cls_t, token_pred, token_t, mask, scores,
                   keep_rate, cls_weight, ratio_weight, cls_distill_weight,
                   token_distill_weight, mse_token):
    def log_softmax(x):
        m = x.max(-1, keepdims=True)
        s = x - m
        return s - np.log(np.exp(s).sum(-1, keepdims=True))

    pred = np.asarray(pred, np.float32)
    cls_t = np.asarray(cls_t, np.float32)
    token_pred = np.asarray(token_pred, np.float32)
    token_t = np.asarray(token_t, np.float32)
    mask = np.asarray(mask, np.float32)
    labels = np.asarray(labels)

    logp = log_softmax(pred)
    B = pred.shape[0]
    base = -np.mean(logp[np.arange(B), labels])
    loss = base * cls_weight

    pred_loss = 0.0
    for i, s in enumerate(scores):
        s = np.asarray(s, np.float32)
        pred_loss += np.mean((s.mean(1) - keep_rate[i]) ** 2)
    pred_loss /= len(scores)
    loss += pred_loss * ratio_weight

    logq = log_softmax(cls_t)
    cls_kl = np.sum(np.exp(logq) * (logq - logp)) / B
    loss += cls_distill_weight * cls_kl

    Bn, N, C = token_pred.shape
    m = mask.reshape(Bn * N)
    tp = token_pred.reshape(Bn * N, C)
    tt = token_t.reshape(Bn * N, C)
    if m.sum() >= 0.1:
        sel = m > 0.5
        tp, tt = tp[sel], tt[sel]
        if mse_token:
            tok_loss = np.mean((tp - tt) ** 2)
        else:
            ltp, ltt = log_softmax(tp), log_softmax(tt)
            tok_loss = np.sum(np.exp(ltt) * (ltt - ltp)) / tp.shape[0]
        loss += token_distill_weight * tok_loss
    return np.float32(loss)


# ---------------------------------------------------------------------------
if __name__ == "__main__":
    key = jax.random.PRNGKey(0)
    ks = jax.random.split(key, 10)

    # small shapes consistent with the module
    B, Cin, H, W = 2, 3, 16, 16
    patch = 4
    N = (H // patch) * (W // patch)           # 16 tokens
    C = 32                                    # token embedding dim
    num_classes = 16
    keep_rate = (0.7, 0.49)                   # model.token_ratio
    L = len(keep_rate)

    # loss hyper-parameters (module __init__ args)
    cls_weight = 1.0
    ratio_weight = 2.0
    cls_distill_weight = 0.5
    token_distill_weight = 0.5

    # deterministic synthetic teacher parameters (linear patch embed + head)
    patch_dim = Cin * patch * patch
    w_patch = 0.05 * jax.random.normal(ks[0], (patch_dim, C), jnp.float32)
    w_head = 0.05 * jax.random.normal(ks[1], (C, num_classes), jnp.float32)
    teacher_params = (w_patch, w_head)

    # student outputs + data
    inputs = jax.random.normal(ks[2], (B, Cin, H, W), jnp.float32)
    pred = jax.random.normal(ks[3], (B, num_classes), jnp.float32)
    token_pred = jax.random.normal(ks[4], (B, N, C), jnp.float32)
    mask = (jax.random.uniform(ks[5], (B, N)) > 0.3).astype(jnp.float32)
    out_pred_score = [jax.nn.sigmoid(jax.random.normal(ks[6 + i], (B, N)))
                      for i in range(L)]
    labels = jax.random.randint(ks[8], (B,), 0, num_classes)

    outputs = (pred, token_pred, mask, out_pred_score)

    cls_t_ref, token_t_ref = reference_teacher(inputs, w_patch, w_head, patch)

    for mse_token in (True, False):           # exercise both distill paths
        loss = dynamicvit_distill_loss(
            inputs, outputs, labels,
            keep_rate=keep_rate, teacher_params=teacher_params, patch=patch,
            cls_weight=cls_weight, ratio_weight=ratio_weight,
            cls_distill_weight=cls_distill_weight,
            token_distill_weight=token_distill_weight, mse_token=mse_token,
            block_rows=16,                    # 2 row tiles -> exercises the
            num_core_splits=2)                # 2-way core split at toy size
        loss = jax.block_until_ready(loss)

        ref = reference_loss(
            np.asarray(pred), np.asarray(labels), cls_t_ref,
            np.asarray(token_pred), token_t_ref, np.asarray(mask),
            [np.asarray(s) for s in out_pred_score],
            keep_rate, cls_weight, ratio_weight, cls_distill_weight,
            token_distill_weight, mse_token)
        np.testing.assert_allclose(np.asarray(loss), ref, rtol=1e-4, atol=1e-5)

    print("KERNEL_OK")
</pallas_src>

<mosaic_0001>
module attributes {stable_mosaic.version = 11 : i64} {
  func.func @_token_path_kernel(%arg0: i32, %arg1: i32, %arg2: memref<16x48xbf16, #tpu.memory_space<vmem>>, %arg3: memref<48x32xbf16, #tpu.memory_space<vmem>>, %arg4: memref<16x32xf32, #tpu.memory_space<vmem>>, %arg5: memref<1x1x16xf32, #tpu.memory_space<vmem>>, %arg6: memref<1x1x32xf32, #tpu.memory_space<vmem>>, %arg7: memref<1x2x32xf32, #tpu.memory_space<vmem>>) attributes {dimension_semantics = [#tpu.dimension_semantics<parallel>, #tpu.dimension_semantics<arbitrary>], iteration_bounds = array<i64: 2, 1>, scalar_prefetch = 0 : i64, scratch_operands = 0 : i64, tpu.core_type = #tpu.core_type<tc>, window_params = [{transform_indices = @transform_0, window_bounds = array<i64: 16, 48>}, {pipeline_mode = #tpu.pipeline_mode<synchronous>, transform_indices = @transform_1, window_bounds = array<i64: 48, 32>}, {transform_indices = @transform_2, window_bounds = array<i64: 16, 32>}, {transform_indices = @transform_3, window_bounds = array<i64: 1, 1, 16>}, {transform_indices = @transform_4, window_bounds = array<i64: 1, 1, 32>}, {transform_indices = @transform_5, window_bounds = array<i64: 1, 2, 32>}]} {
    %c0_i32 = arith.constant 0 : i32
    %0 = arith.cmpi eq, %arg1, %c0_i32 : i32
    %1 = arith.extui %0 : i1 to i32
    %c0_i32_0 = arith.constant 0 : i32
    %2 = arith.cmpi ne, %1, %c0_i32_0 : i32
    scf.if %2 {
      %cst_27 = arith.constant 0.000000e+00 : f32
      %47 = vector.broadcast %cst_27 : f32 to vector<1x32xf32>
      %c0_28 = arith.constant 0 : index
      %c0_29 = arith.constant 0 : index
      %c0_30 = arith.constant 0 : index
      %48 = vector.load %arg6[%c0_28, %c0_29, %c0_30] : memref<1x1x32xf32, #tpu.memory_space<vmem>>, vector<1x1x32xf32>
      %49 = vector.shape_cast %48 : vector<1x1x32xf32> to vector<1x32xf32>
      %50 = vector.shape_cast %47 : vector<1x32xf32> to vector<1x1x32xf32>
      tpu.vector_store %arg6[%c0_28, %c0_29, %c0_30], %50 {strides = array<i32>} : memref<1x1x32xf32, #tpu.memory_space<vmem>>, vector<1x1x32xf32>,
      %cst_31 = arith.constant 0.000000e+00 : f32
      %51 = vector.broadcast %cst_31 : f32 to vector<2x32xf32>
      %c0_32 = arith.constant 0 : index
      %c0_33 = arith.constant 0 : index
      %c0_34 = arith.constant 0 : index
      %52 = vector.load %arg7[%c0_32, %c0_33, %c0_34] : memref<1x2x32xf32, #tpu.memory_space<vmem>>, vector<1x2x32xf32>
      %53 = vector.shape_cast %52 : vector<1x2x32xf32> to vector<2x32xf32>
      %54 = vector.shape_cast %51 : vector<2x32xf32> to vector<1x2x32xf32>
      tpu.vector_store %arg7[%c0_32, %c0_33, %c0_34], %54 {strides = array<i32>} : memref<1x2x32xf32, #tpu.memory_space<vmem>>, vector<1x2x32xf32>,
    } else {
    }
    %c0 = arith.constant 0 : index
    %c0_1 = arith.constant 0 : index
    %3 = vector.load %arg2[%c0, %c0_1] : memref<16x48xbf16, #tpu.memory_space<vmem>>, vector<16x48xbf16>
    %c0_2 = arith.constant 0 : index
    %c0_3 = arith.constant 0 : index
    %4 = vector.load %arg3[%c0_2, %c0_3] : memref<48x32xbf16, #tpu.memory_space<vmem>>, vector<48x32xbf16>
    %cst = arith.constant dense<0.000000e+00> : vector<16x32xf32>
    %5 = tpu.matmul %3, %4, %cst {dimension_numbers = #tpu.dot_dimension_numbers<[1], [0], [0], [1], [0, 0, 1, 1], [], []>} : vector<16x48xbf16>, vector<48x32xbf16>, vector<16x32xf32> -> vector<16x32xf32>
    %c0_4 = arith.constant 0 : index
    %c0_5 = arith.constant 0 : index
    %6 = vector.load %arg4[%c0_4, %c0_5] : memref<16x32xf32, #tpu.memory_space<vmem>>, vector<16x32xf32>
    %c0_6 = arith.constant 0 : index
    %c0_7 = arith.constant 0 : index
    %c0_8 = arith.constant 0 : index
    %7 = vector.load %arg5[%c0_6, %c0_7, %c0_8] : memref<1x1x16xf32, #tpu.memory_space<vmem>>, vector<1x1x16xf32>
    %8 = vector.shape_cast %7 : vector<1x1x16xf32> to vector<1x16xf32>
    %cst_9 = arith.constant 5.000000e-01 : f32
    %9 = vector.broadcast %cst_9 : f32 to vector<1x16xf32>
    %10 = arith.cmpf ogt, %8, %9 : vector<1x16xf32>
    %11 = arith.extui %10 : vector<1x16xi1> to vector<1x16xi32>
    %12 = arith.sitofp %11 : vector<1x16xi32> to vector<1x16xf32>
    %13 = arith.subf %6, %5 : vector<16x32xf32>
    %14 = arith.mulf %13, %13 : vector<16x32xf32>
    %c0_10 = arith.constant 0 : index
    %c0_11 = arith.constant 0 : index
    %c0_12 = arith.constant 0 : index
    %15 = vector.load %arg6[%c0_10, %c0_11, %c0_12] : memref<1x1x32xf32, #tpu.memory_space<vmem>>, vector<1x1x32xf32>
    %16 = vector.shape_cast %15 : vector<1x1x32xf32> to vector<1x32xf32>
    %cst_13 = arith.constant dense<0.000000e+00> : vector<1x32xf32>
    %17 = tpu.matmul %12, %14, %cst_13 {dimension_numbers = #tpu.dot_dimension_numbers<[1], [0], [0], [1], [0, 0, 1, 1], [], []>, precision = #tpu.contract_precision<fp32>} : vector<1x16xf32>, vector<16x32xf32>, vector<1x32xf32> -> vector<1x32xf32>
    %18 = arith.addf %16, %17 : vector<1x32xf32>
    %c0_14 = arith.constant 0 : index
    %c0_15 = arith.constant 0 : index
    %c0_16 = arith.constant 0 : index
    %19 = vector.load %arg6[%c0_14, %c0_15, %c0_16] : memref<1x1x32xf32, #tpu.memory_space<vmem>>, vector<1x1x32xf32>
    %20 = vector.shape_cast %19 : vector<1x1x32xf32> to vector<1x32xf32>
    %21 = vector.shape_cast %18 : vector<1x32xf32> to vector<1x1x32xf32>
    tpu.vector_store %arg6[%c0_14, %c0_15, %c0_16], %21 {strides = array<i32>} : memref<1x1x32xf32, #tpu.memory_space<vmem>>, vector<1x1x32xf32>,
    %c1_i32 = arith.constant 1 : i32
    %22 = arith.muli %arg0, %c1_i32 : i32
    %23 = arith.addi %22, %arg1 : i32
    %c16_i32 = arith.constant 16 : i32
    %24 = arith.muli %23, %c16_i32 : i32
    %25 = tpu.iota {dimensions = array<i32: 0>} : vector<2x16xi32>
    %26 = tpu.iota {dimensions = array<i32: 1>} : vector<2x16xi32>
    %27 = vector.broadcast %24 : i32 to vector<2x16xi32>
    %28 = arith.addi %27, %26 : vector<2x16xi32>
    %c16_i32_17 = arith.constant 16 : i32
    %29 = vector.broadcast %c16_i32_17 : i32 to vector<2x16xi32>
    %30 = arith.muli %25, %29 : vector<2x16xi32>
    %31 = arith.cmpi sge, %28, %30 : vector<2x16xi32>
    %c1_i32_18 = arith.constant 1 : i32
    %32 = vector.broadcast %c1_i32_18 : i32 to vector<2x16xi32>
    %33 = arith.addi %25, %32 : vector<2x16xi32>
    %c16_i32_19 = arith.constant 16 : i32
    %34 = vector.broadcast %c16_i32_19 : i32 to vector<2x16xi32>
    %35 = arith.muli %33, %34 : vector<2x16xi32>
    %36 = arith.cmpi slt, %28, %35 : vector<2x16xi32>
    %37 = arith.andi %31, %36 : vector<2x16xi1>
    %38 = arith.extui %37 : vector<2x16xi1> to vector<2x16xi32>
    %39 = arith.sitofp %38 : vector<2x16xi32> to vector<2x16xf32>
    %c0_20 = arith.constant 0 : index
    %c0_21 = arith.constant 0 : index
    %c0_22 = arith.constant 0 : index
    %40 = vector.load %arg7[%c0_20, %c0_21, %c0_22] : memref<1x2x32xf32, #tpu.memory_space<vmem>>, vector<1x2x32xf32>
    %41 = vector.shape_cast %40 : vector<1x2x32xf32> to vector<2x32xf32>
    %cst_23 = arith.constant dense<0.000000e+00> : vector<2x32xf32>
    %42 = tpu.matmul %39, %5, %cst_23 {dimension_numbers = #tpu.dot_dimension_numbers<[1], [0], [0], [1], [0, 0, 1, 1], [], []>, precision = #tpu.contract_precision<fp32>} : vector<2x16xf32>, vector<16x32xf32>, vector<2x32xf32> -> vector<2x32xf32>
    %43 = arith.addf %41, %42 : vector<2x32xf32>
    %c0_24 = arith.constant 0 : index
    %c0_25 = arith.constant 0 : index
    %c0_26 = arith.constant 0 : index
    %44 = vector.load %arg7[%c0_24, %c0_25, %c0_26] : memref<1x2x32xf32, #tpu.memory_space<vmem>>, vector<1x2x32xf32>
    %45 = vector.shape_cast %44 : vector<1x2x32xf32> to vector<2x32xf32>
    %46 = vector.shape_cast %43 : vector<2x32xf32> to vector<1x2x32xf32>
    tpu.vector_store %arg7[%c0_24, %c0_25, %c0_26], %46 {strides = array<i32>} : memref<1x2x32xf32, #tpu.memory_space<vmem>>, vector<1x2x32xf32>,
    return
  }
  func.func @transform_0(%arg0: i32, %arg1: i32) -> (i32, i32) {
    %c1_i32 = arith.constant 1 : i32
    %0 = arith.muli %arg0, %c1_i32 : i32
    %1 = arith.addi %0, %arg1 : i32
    %c0_i32 = arith.constant 0 : i32
    %c0_i32_0 = arith.constant 0 : i32
    return %1, %c0_i32 : i32, i32
  }
  func.func @transform_1(%arg0: i32, %arg1: i32) -> (i32, i32) {
    %c0_i32 = arith.constant 0 : i32
    %c0_i32_0 = arith.constant 0 : i32
    %c0_i32_1 = arith.constant 0 : i32
    return %c0_i32, %c0_i32_0 : i32, i32
  }
  func.func @transform_2(%arg0: i32, %arg1: i32) -> (i32, i32) {
    %c1_i32 = arith.constant 1 : i32
    %0 = arith.muli %arg0, %c1_i32 : i32
    %1 = arith.addi %0, %arg1 : i32
    %c0_i32 = arith.constant 0 : i32
    %c0_i32_0 = arith.constant 0 : i32
    return %1, %c0_i32 : i32, i32
  }
  func.func @transform_3(%arg0: i32, %arg1: i32) -> (i32, i32, i32) {
    %c1_i32 = arith.constant 1 : i32
    %0 = arith.muli %arg0, %c1_i32 : i32
    %1 = arith.addi %0, %arg1 : i32
    %c0_i32 = arith.constant 0 : i32
    %c0_i32_0 = arith.constant 0 : i32
    %c0_i32_1 = arith.constant 0 : i32
    return %1, %c0_i32, %c0_i32_0 : i32, i32, i32
  }
  func.func @transform_4(%arg0: i32, %arg1: i32) -> (i32, i32, i32) {
    %c0_i32 = arith.constant 0 : i32
    %c0_i32_0 = arith.constant 0 : i32
    %c0_i32_1 = arith.constant 0 : i32
    return %arg0, %c0_i32, %c0_i32_0 : i32, i32, i32
  }
  func.func @transform_5(%arg0: i32, %arg1: i32) -> (i32, i32, i32) {
    %c0_i32 = arith.constant 0 : i32
    %c0_i32_0 = arith.constant 0 : i32
    %c0_i32_1 = arith.constant 0 : i32
    return %arg0, %c0_i32, %c0_i32_0 : i32, i32, i32
  }
}

</mosaic_0001>

<bundles_post_ra>
// kernel: tpu_custom_call.1
= control target key start
LH: loop header
LB: loop body
LE: loop exit
PB: predicated region body
PF: predicated region fallthrough
CT: control target
= control target key end

     0   :  { %11 = vsyncpa [#allocation3], 0  ;;  %s2312_s0 = inlined_call_operand.hbm [shape: bf16[32,48], index: 0, kind: input, shape index: {}]   ;;  %s2313_s1 = inlined_call_operand.vmem [shape: bf16[48,32], index: 1, kind: input, shape index: {}]   ;;  %s2314_s2 = inlined_call_operand.vmem [shape: f32[32,32], index: 2, kind: input, shape index: {}]   ;;  %s2315_s3 = inlined_call_operand.vmem [shape: f32[2,1,16], index: 3, kind: input, shape index: {}]   ;;  %s2316_s4 = inlined_call_operand.hbm [shape: f32[2,1,32], index: 4, kind: output, shape index: {0}]   ;;  %s2317_s5 = inlined_call_operand.hbm [shape: f32[2,2,32], index: 5, kind: output, shape index: {1}]  }
   0x1   :  { %13 = vsyncpa [#allocation3 + $0x1], 0 }
   0x2   :  { %14 = vsyncpa [#allocation4], 0 }
   0x3   :  { %16 = vsyncpa [#allocation4 + $0x1], 0 }
   0x4   :  { %17 = vsyncpa [#allocation7], 0 }
   0x5   :  { %19 = vsyncpa [#allocation7 + $0x1], 0  ;;  %s1985_s18 = smov 0   ;;  %s1987_s19 = smov 0  }
   0x6   :  { %s1989_s20 = smov 0   ;;  %s1991_s21 = smov 0  }
   0x7   :  { %s1993_s22 = smov 0   ;;  %s1995_s23 = smov 0  }
   0x8 LB: > { %s1523_s24 = sadd.s32 4294967295, %s1945_s23   ;;  %s1524_s25 = sadd.s32 4294967294, %s1945_s23   ;;  %s1945_s23 = sphi %s1995_s23, %s25_s23   ;;  %s1941_s22 = sphi %s1993_s22, %s2332_s22   ;;  %s1937_s21 = sphi %s1991_s21, %s2331_s21   ;;  %s1933_s20 = sphi %s1989_s20, %s2330_s20   ;;  %s1929_s19 = sphi %s1987_s19, %s2329_s19   ;;  %s1925_s18 = sphi %s1985_s18, %s2328_s18  }
   0x9   : > { %s37_s26 = sadd.s32 1, %s1941_s22  ;;  %s46_s27 = sadd.s32 1, %s1933_s20 }
   0xa   : > { %p39_p0 = scmp.ge.s32.totalorder %s37_s26, 2  ;;  %p53_p1 = scmp.ne.s32.totalorder %s1933_s20, %s1929_s19 }
   0xb   : > { %p54_p2 = scmp.eq.s32.totalorder %s1945_s23, 0  ;;  %p59_p3 = scmp.ne.s32.totalorder %s1929_s19, %s1925_s18 }
   0xc   : > { %s2334_s26 = smov (%p39_p0, %s37_s26), 0  ;;  %p60_p5 = scmp.eq.s32.totalorder %s1523_s24, 0 }
   0xd   : > { %p2026_p4 = por %p54_p2, %p53_p1  ;;  %s43_s29 = ssub.s32 %s1941_s22, %s2334_s26 }
   0xe   : > { %p160_p6 = scmp.eq.s32.totalorder %s1523_s24, 1  ;;  %p44_p7 = scmp.eq.s32.totalorder %s43_s29, 0 }
   0xf   : > { %p2032_p8 = por %p60_p5, %p59_p3  ;;  %p166_p10 = scmp.eq.s32.totalorder %s1524_s25, 1 }
  0x10   : > { %p2036_p9 = por %p160_p6, %p53_p1  ;;  %p1742_p13 = scmp.lt.s32.totalorder %s1945_s23, 2 }
  0x11   : > { %s2041_s7 = scalar_select %p44_p7, %s1933_s20, %s46_s27  }
  0x12   : > { %s2321_s6 = scalar_select %p2036_p9, 1, 0 }
  0x13   : > { %p2043_p11 = por %p166_p10, %p59_p3  ;;  %s215_s9 = sand.u32 1, %s1933_s20  }
  0x14   : > { %s1527_s10 = sshll.u32 %s215_s9, 3  ;;  %s1554_s11 = sshll.u32 %s1941_s22, 7 }
  0x15   : > { %s2322_s8 = scalar_select %p2043_p11, 1, 0 }
  0x16   : > { %s2054_s14 = scalar_lea.hbm %s2312_s0, %s1554_s11  ;;  %s219_s15 = scalar_lea.vmem [#allocation2], %s1527_s10 }
  0x17   : > { %s227_s16 = sshll.u32 %s219_s15, 4  ;;  %p2060_p0 = pnand %p1742_p13, %p2026_p4  ;;  %s2056_s16 = int_to_ptr.vmem [resolvable:$true] %s227_s16 }
  0x18   : > { %s2065_s24 = scalar_lea.sflag [#allocation3], %s215_s9  ;;  %s1801_s25 = scalar_lea.hbm %s2054_s14, 128 }
  0x19   : > { %p1802_p2 = scmp.ne.s32.totalorder %s2054_s14, %s1801_s25  ;;  %p1803_p3 = pneg %p2060_p0 }
  0x1a   : > { %s1806_s28 = scalar_lea.hbm %s2312_s0, 256  ;;  %p1807_p4 = scmp.lt.u32.totalorder %s2054_s14, %s2312_s0 }
  0x1b   : > { %p1804_p5 = pnand %p1803_p3, %p1802_p2  ;;  %p1808_p7 = scmp.lt.u32.totalorder %s1806_s28, %s1801_s25 }
  0x1c   : > { %p1810_p13 = scmp.lt.u32.totalorder %s1801_s25, %s2054_s14 }
  0x1d   : > { %p1805_p6 = pneg %p1804_p5  ;;  %p1809_p10 = por %p1808_p7, %p1807_p4 }
  0x1f   : > { %p1811_p12 = por %p1810_p13, %p1809_p10 }
  0x21   : > { %p1812_p1 = pnand %p1811_p12, %p1805_p6 }
  0x23   : > { %1815 = shalt.err (!%p1812_p1)
}
  0x24   : > { %s1816_s9 = scalar_lea.vmem %s2056_s16, 128  ;;  %s1947_s12 = smov [#allocation2]  }
  0x25   : > { %p1817_p2 = scmp.ne.s32.totalorder %s2056_s16, %s1816_s9  ;;  %s1821_s13 = sshll.u32 %s1947_s12, 4  ;;  %s1822_s13 = int_to_ptr.vmem [resolvable:$false] %s1821_s13 }
  0x26   : > { %s1823_s15 = scalar_lea.vmem %s1822_s13, 256  ;;  %p1824_p9 = scmp.lt.s32.totalorder %s2056_s16, %s1822_s13 }
  0x27   : > { %p1819_p5 = pnand %p1817_p2, %p1803_p3  ;;  %p1825_p4 = scmp.lt.s32.totalorder %s1823_s15, %s1816_s9 }
  0x29   : > { %p1820_p11 = pneg %p1819_p5  ;;  %p1826_p7 = por %p1825_p4, %p1824_p9 }
  0x2b   : > { %p1827_p10 = pnand %p1826_p7, %p1820_p11 }
  0x2d   : > { %1830 = shalt.err (!%p1827_p10)
}
  0x2e   : > { %s1948_s25 = smov 64   ;;  %s1949_s27 = smov 4  }
  0x2f   : > { %1734 = dma.hbm_to_vmem [thread:$0]  (!%p2060_p0), %s2054_s14, 128, %s2056_s16, %s2065_s24, %s1948_s25, %s1948_s25, %s1949_s27  }
  0x30   : > { %p254_p12 = scmp.lt.s32.totalorder %s1945_s23, 3  ;;  %p2324_p1 = scmp.ge.s32.totalorder %s1945_s23, 1 }
  0x32   : > { %p255_p3 = pnand %p2324_p1, %p254_p12 }
  0x33   : > { %s2097_s29 = sand.u32 (!%p255_p3), 1, %s1929_s19  }
  0x34   : > { %258 = sbr.rel (%p255_p3) target bundleno = 572 (0x23c), region = 36  ;;  %s1531_s28 = sshll.u32 (!%p255_p3), %s2097_s29, 3 }
  0x35   : > { %s261_s10 = scalar_lea.sflag (!%p255_p3), [#allocation3], %s2097_s29  ;;  %s264_s11 = scalar_lea.vmem (!%p255_p3), [#allocation2], %s1531_s28 }
  0x3b   : > { %1912 = dma.done.wait (%p2032_p8), %s261_s10, 128  }
  0x3c   : > { %1914 = vsyncadd (%p2032_p8), %s261_s10, 4294967168  ;;  %v1950_v0 = vmov 0.0   ;;  %vm1951_vm0 = vmmov 0   ;;  %v1797_v1 = vld [vmem:[%s2313_s1] sm:$0xff]   ;;  %v1798_v2 = vld [vmem:[%s2313_s1 + $0x8] sm:$0xff]   ;;  %vm360_vm1 = vcmask 392192   ;;  %v884_v6 = vlaneseq }
  0x3d   : > { %1595 = vmatprep.subr.bf16.mxu0 %v1950_v0  ;;  %1601 = vmatprep.mubr.msk.bf16.mxu0 %vm1951_vm0, %v1950_v0  ;;  %v1799_v3 = vld [vmem:[%s2313_s1 + $0x10] sm:$0xff]   ;;  %v1800_v4 = vld [vmem:[%s264_s11] sm:$0xff]   ;;  %v1952_v5 = vmov 0.0|0.0   ;;  %p316_p8 = scmp.lt.s32.totalorder %s1937_s21, 1  ;;  %s1533_s13 = sshll.u32 %s1937_s21, 1  ;;  %vm416_vm3 = vcmask 130048  }
  0x3e   : > { %1609 = vmatprep.mubr.msk.f32.mxu1 %vm1951_vm0, %v1950_v0  ;;  %1596 = vmatpush3.bf16.msra.mxu0 %v1797_v1  ;;  %v885_v7 = vshrl.u32 %v884_v6, 7  ;;  %s1544_s28 = sshll.u32 %s1937_s21, 4  ;;  %p309_p9 = scmp.lt.s32.totalorder %s1533_s13, 3  ;;  %v887_v8 = vand.u32 127, %v884_v6  ;;  %vm325_vm7 = vcmask 253952   ;;  %vm327_vm8 = vcmask 254976  }
  0x3f   : > { %1597 = vmatprep.subr.bf16.mxu0 %v1950_v0  ;;  %1689 = vmatprep.subr.bf16.mxu1 %v1952_v5  ;;  %s317_s12 = scalar_select %p316_p8, %s1937_s21, 1  ;;  %v888_v11 = vstv %s1544_s28 }
  0x40   : > { %v892_v9 = vadd.s32 1, %v885_v7  ;;  %s2336_s13 = smov (!%p309_p9, %s1533_s13), 3  ;;  %v889_v12 = vadd.s32 %v888_v11, %v887_v8  ;;  %v890_v13 = vmul.u32 16, %v885_v7  ;;  %s2209_s17 = scalar_lea.vmem [#allocation5], %s2097_s29 }
  0x41   : > { %s318_s27 = scalar_lea.vmem %s2315_s3, %s317_s12  ;;  %s1534_s10 = sshll.u32 %s2336_s13, 3  ;;  %326 = vst.msk [vmem:[%s2209_s17] sm:$0x1] %vm325_vm7, %v1950_v0 }
  0x42   : > { %1598 = vmatpush3.bf16.msra.mxu0 %v1798_v2  ;;  %v407_v10 = vld [vmem:[%s318_s27] sm:$0x1]  ;;  %v893_v14 = vmul.u32 16, %v892_v9  ;;  %vm891_vm4 = vcmp.ge.s32.totalorder %v889_v12, %v890_v13  ;;  %s312_s16 = scalar_lea.vmem %s2314_s2, %s1534_s10  ;;  %s1532_s24 = sshll.u32 %s2097_s29, 1 }
  0x43   : > { %1599 = vmatprep.subr.bf16.mxu0 %v1950_v0  ;;  %vm408_vm2 = vcmp.gt.f32.partialorder %v407_v10, 0.5  ;;  %v405_v17 = vld [vmem:[%s312_s16] sm:$0xff]  ;;  %v406_v21 = vld [vmem:[%s312_s16 + $0x8] sm:$0xff]  ;;  %s2215_s30 = scalar_lea.vmem [#allocation6], %s1532_s24  ;;  %s1382_s9 = sshll.u32 %s2209_s17, 4  ;;  %s2229_s9 = int_to_ptr.vmem [resolvable:$true] %s1382_s9 }
  0x44   : > { %v2135_v15 = vsel %vm408_vm2, 1.0, %v1950_v0  ;;  %vm894_vm5 = vcmp.lt.s32.totalorder %v889_v12, %v893_v14  ;;  %328 = vst.msk [vmem:[%s2215_s30] sm:$0x3] %vm327_vm8, %v1950_v0  ;;  %s2227_s15 = scalar_lea.hbm %s2316_s4, %s1544_s28  ;;  %s1365_s25 = scalar_lea.sflag [#allocation4], %s2097_s29 }
  0x45   : > { %v418_v16 = vsel %vm416_vm3, %v2135_v15, 0  ;;  %vm895_vm6 = vmand %vm891_vm4, %vm894_vm5  ;;  %s1831_s27 = scalar_lea.vmem %s2229_s9, 16  ;;  %p2325_p0 = scmp.ne.s32.totalorder %s2321_s6, 0 }
  0x46   : > { %1600 = vmatpush3.bf16.msra.mxu0 %v1799_v3  ;;  %v2142_v18 = vsub.f32 %v418_v16, %v418_v16  ;;  %v2145_v19 = vsel %vm895_vm6, 1.0, %v1950_v0  ;;  %p1832_p11 = scmp.ne.s32.totalorder %s2229_s9, %s1831_s27  ;;  %s1953_s10 = smov [#allocation5]  }
  0x47   : > { %1701 = vmatprep.subr.bf16.mxu0 %v1952_v5  ;;  %v900_v27 = vsel %vm416_vm3, %v2145_v19, 0  ;;  %s1835_s11 = sshll.u32 %s1953_s10, 4  ;;  %s1836_s11 = int_to_ptr.vmem [resolvable:$false] %s1835_s11 }
  0x48   : > { %v489_v26 = vand.u32 4294901760, %v2142_v18  ;;  %v2155_v39 = vsub.f32 %v900_v27, %v900_v27  ;;  %p1833_p6 = pnand %p1832_p11, %p2325_p0  ;;  %s1837_s28 = scalar_lea.vmem %s1836_s11, 32 }
  0x49   : > { %1602 = vmatmul.mubr.msk.bf16.vlgmr.msra.gmra.mrb[0].mxu0 %vm360_vm1, %v1800_v4  ;;  %p1838_p2 = scmp.lt.s32.totalorder %s2229_s9, %s1836_s11  ;;  %p1839_p5 = scmp.lt.s32.totalorder %s1837_s28, %s1831_s27 }
  0x4a   : > { %1637 = vmatprep.mubr.msk.f32.mxu0 %vm1951_vm0, %v1950_v0  ;;  %v490_v38 = vsub.f32 %v2142_v18, %v489_v26  ;;  %v971_v50 = vand.u32 4294901760, %v2155_v39  ;;  %p1834_p13 = pneg %p1833_p6 }
  0x4b   : > { %p1840_p4 = por %p1839_p5, %p1838_p2 }
  0x4c   : > { %v491_v49 = vand.u32 4294901760, %v490_v38  ;;  %v972_v59 = vsub.f32 %v2155_v39, %v971_v50 }
  0x4d   : > { %p1841_p7 = pnand %p1840_p4, %p1834_p13 }
  0x4e   : > { %v973_v1 = vand.u32 4294901760, %v972_v59 }
 0x11c   : > { %v398_v20 = vpop.f32.mrb[0].mxu0 }
 0x11d   : > { %v411_v22 = vsub.f32 %v405_v17, %v398_v20  ;;  %v903_v23 = vand.u32 4294901760, %v398_v20  ;;  %v1603_v24 = vpop.f32.mrb[1].mxu0 }
 0x11e   : > { %v401_v25 = vpop.f32.mrb[2].mxu0 }
 0x11f   : > { %v413_v28 = vmul.f32 %v411_v22, %v411_v22  ;;  %v981_v29 = vsub.f32 %v398_v20, %v903_v23  ;;  %v412_v30 = vsub.f32 %v406_v21, %v401_v25  ;;  %v906_v31 = vand.u32 4294901760, %v401_v25  ;;  %v1604_v32 = vpop.f32.mrb[3].mxu0  ;;  %v415_v21 = vld [vmem:[%s2209_s17] sm:$0x1] }
 0x121   : > { %v421_v33 = vand.u32 4294901760, %v413_v28  ;;  %v982_v34 = vand.u32 4294901760, %v981_v29  ;;  %v414_v35 = vmul.f32 %v412_v30, %v412_v30  ;;  %v2150_v36 = vpack.c.bf16 %v906_v31, %v903_v23 }
 0x122   : > { %v988_v37 = vsub.f32 %v401_v25, %v906_v31 }
 0x123   : > { %v499_v40 = vsub.f32 %v413_v28, %v421_v33  ;;  %v424_v41 = vand.u32 4294901760, %v414_v35  ;;  %v983_v42 = vsub.f32 %v981_v29, %v982_v34 }
 0x124   : > { %v989_v43 = vand.u32 4294901760, %v988_v37  ;;  %v1714_v44 = vpack.c.bf16 %v988_v37, %v981_v29 }
 0x125   : > { %v506_v45 = vsub.f32 %v414_v35, %v424_v41  ;;  %v1690_v46 = vpack.c.bf16 %v424_v41, %v421_v33  ;;  %v500_v47 = vand.u32 4294901760, %v499_v40  ;;  %v984_v55 = vand.u32 4294901760, %v983_v42 }
 0x126   : > { %v990_v48 = vsub.f32 %v988_v37, %v989_v43  ;;  %v1720_v51 = vpack.c.bf16 %v989_v43, %v982_v34 }
 0x127   : > { %1691 = vmatpush3.bf16.msra.mxu1 %v1690_v46  ;;  %v507_v52 = vand.u32 4294901760, %v506_v45  ;;  %v501_v53 = vsub.f32 %v499_v40, %v500_v47  ;;  %v1696_v54 = vpack.c.bf16 %v506_v45, %v499_v40 }
 0x128   : > { %v991_v56 = vand.u32 4294901760, %v990_v48  ;;  %1692 = vmatprep.subr.bf16.mxu1 %v1952_v5 }
 0x129   : > { %v1702_v57 = vpack.c.bf16 %v507_v52, %v500_v47  ;;  %v508_v58 = vsub.f32 %v506_v45, %v507_v52  ;;  %v502_v61 = vand.u32 4294901760, %v501_v53 }
 0x12a   : > { %1610 = vmatmul.mubr.f32.vlgmr.msra.gmra.mrb[0].mxu1 %v491_v49  ;;  %v1711_v60 = vpack.c.bf16 %v991_v56, %v984_v55 }
 0x12b   : > { %1703 = vmatpush3.bf16.msra.mxu0 %v1702_v57  ;;  %v509_v62 = vand.u32 4294901760, %v508_v58  ;;  %1616 = vmatprep.mubr.msk.f32.mxu1 %vm1951_vm0, %v1950_v0 }
 0x12c   : > { %1707 = vmatprep.subr.bf16.mxu0 %v1952_v5 }
 0x12d   : > { %v1693_v63 = vpack.c.bf16 %v509_v62, %v502_v61 }
 0x12e   : > { %1638 = vmatmul.mubr.msk.f32.vlgmr.msra.gmra.mrb[4].mxu0 %vm416_vm3, %v2135_v15 }
 0x12f   : > { %1694 = vmatpush3.bf16.msra.mxu1 %v1693_v63  ;;  %1709 = vmatpush3.bf16.msra.mxu0 %v2150_v36 }
 0x130   : > { %1695 = vmatprep.subr.bf16.mxu1 %v1952_v5  ;;  %1651 = vmatprep.mubr.msk.f32.mxu0 %vm1951_vm0, %v1950_v0 }
 0x131   : > { %1713 = vmatprep.subr.bf16.mxu0 %v1952_v5 }
 0x132   : > { %1617 = vmatmul.mubr.msk.f32.vlgmr.msra.gmra.mrb[2].mxu1 %vm416_vm3, %v2135_v15  ;;  %1652 = vmatmul.mubr.f32.vlgmr.msra.gmra.mrb[6].mxu0 %v973_v1 }
 0x133   : > { %1697 = vmatpush3.bf16.msra.mxu1 %v1696_v54  ;;  %1715 = vmatpush3.bf16.msra.mxu0 %v1714_v44 }
 0x134   : > { %1623 = vmatprep.mubr.msk.f32.mxu1 %vm1951_vm0, %v1950_v0  ;;  %1698 = vmatprep.subr.bf16.mxu1 %v1952_v5 }
 0x135   : > { %1665 = vmatprep.mubr.msk.f32.mxu0 %vm1951_vm0, %v1950_v0  ;;  %1719 = vmatprep.subr.bf16.mxu0 %v1952_v5 }
 0x136   : > { %1624 = vmatmul.mubr.f32.vlgmr.msra.gmra.mrb[4].mxu1 %v2142_v18  ;;  %1666 = vmatmul.mubr.f32.vlgmr.msra.gmra.mrb[8].mxu0 %v2155_v39 }
 0x137   : > { %1700 = vmatpush3.bf16.msra.mxu1 %v1690_v46  ;;  %1721 = vmatpush3.bf16.msra.mxu0 %v1720_v51 }
 0x138   : > { %1630 = vmatprep.mubr.msk.f32.mxu1 %vm1951_vm0, %v1950_v0  ;;  %1704 = vmatprep.subr.bf16.mxu1 %v1952_v5 }
 0x139   : > { %1679 = vmatprep.mubr.msk.f32.mxu0 %vm1951_vm0, %v1950_v0 }
 0x13a   : > { %1631 = vmatmul.mubr.f32.vlgmr.msra.gmra.mrb[6].mxu1 %v489_v26  ;;  %1680 = vmatmul.mubr.msk.f32.vlgmr.msra.gmra.mrb[10].mxu0 %vm416_vm3, %v2145_v19 }
 0x13b   : > { %1706 = vmatpush3.bf16.msra.mxu1 %v1690_v46  ;;  %1644 = vmatprep.mubr.msk.f32.mxu1 %vm1951_vm0, %v1950_v0 }
 0x13c   : > { %1710 = vmatprep.subr.bf16.mxu1 %v1952_v5 }
 0x13e   : > { %1645 = vmatmul.mubr.msk.f32.vlgmr.msra.gmra.mrb[8].mxu1 %vm416_vm3, %v2135_v15 }
 0x13f   : > { %1712 = vmatpush3.bf16.msra.mxu1 %v1711_v60  ;;  %1658 = vmatprep.mubr.msk.f32.mxu1 %vm1951_vm0, %v1950_v0 }
 0x140   : > { %1716 = vmatprep.subr.bf16.mxu1 %v1952_v5 }
 0x142   : > { %1659 = vmatmul.mubr.msk.f32.vlgmr.msra.gmra.mrb[10].mxu1 %vm416_vm3, %v2145_v19 }
 0x143   : > { %1718 = vmatpush3.bf16.msra.mxu1 %v2150_v36  ;;  %1672 = vmatprep.mubr.msk.f32.mxu1 %vm1951_vm0, %v1950_v0 }
 0x144   : > { %1722 = vmatprep.subr.bf16.mxu1 %v1952_v5 }
 0x146   : > { %1673 = vmatmul.mubr.f32.vlgmr.msra.gmra.mrb[12].mxu1 %v971_v50 }
 0x147   : > { %1724 = vmatpush3.bf16.msra.mxu1 %v2150_v36  ;;  %1686 = vmatprep.mubr.msk.f32.mxu1 %vm1951_vm0, %v1950_v0 }
 0x14a   : > { %1687 = vmatmul.mubr.msk.f32.vlgmr.msra.gmra.mrb[14].mxu1 %vm416_vm3, %v2145_v19 }
 0x1fd   : > { %v493_v2 = vpop.f32.mrb[0].mxu1 }
 0x1fe   : > { %v1611_v3 = vpop.f32.mrb[1].mxu1 }
 0x201   : > { %v802_v4 = vpop.f32.mrb[4].mxu0 }
 0x202   : > { %v1639_v5 = vpop.f32.mrb[5].mxu0 }
 0x205   : > { %v574_v6 = vpop.f32.mrb[2].mxu1  ;;  %v975_v7 = vpop.f32.mrb[6].mxu0 }
 0x206   : > { %v575_v8 = vadd.f32 %v574_v6, %v493_v2  ;;  %v1618_v9 = vpop.f32.mrb[3].mxu1  ;;  %v1653_v10 = vpop.f32.mrb[7].mxu0 }
 0x209   : > { %v650_v11 = vpop.f32.mrb[4].mxu1  ;;  %v1132_v12 = vpop.f32.mrb[8].mxu0 }
 0x20a   : > { %v651_v13 = vadd.f32 %v650_v11, %v575_v8  ;;  %v1625_v14 = vpop.f32.mrb[5].mxu1  ;;  %v1667_v15 = vpop.f32.mrb[9].mxu0 }
 0x20d   : > { %v725_v16 = vpop.f32.mrb[6].mxu1  ;;  %v1284_v0 = vpop.f32.mrb[10].mxu0 }
 0x20e   : > { %v726_v17 = vadd.f32 %v725_v16, %v651_v13  ;;  %v1632_v18 = vpop.f32.mrb[7].mxu1  ;;  %v1681_v19 = vpop.f32.mrb[11].mxu0 }
 0x210   : > { %v803_v20 = vadd.f32 %v802_v4, %v726_v17 }
 0x211   : > { %v875_v22 = vpop.f32.mrb[8].mxu1 }
 0x212   : > { %v876_v23 = vadd.f32 %v875_v22, %v803_v20  ;;  %v1646_v24 = vpop.f32.mrb[9].mxu1 }
 0x214   : > { %v879_v25 = vadd.f32 %v876_v23, %v415_v21 }
 0x215   : > { %v1056_v26 = vpop.f32.mrb[10].mxu1 }
 0x216   : > { %881 = vst.msk [vmem:[%s2209_s17] sm:$0x1] %vm325_vm7, %v879_v25  ;;  %v1057_v27 = vadd.f32 %v1056_v26, %v975_v7  ;;  %v1660_v28 = vpop.f32.mrb[11].mxu1 }
 0x217   : > { %1844 = shalt.err (!%p1841_p7)
}
 0x218   : > { %s1845_s14 = scalar_lea.hbm %s2227_s15, 16  ;;  %s1849_s24 = scalar_lea.hbm %s2316_s4, 32 }
 0x219   : > { %p1846_p10 = scmp.ne.s32.totalorder %s2227_s15, %s1845_s14  ;;  %p1850_p3 = scmp.lt.u32.totalorder %s2227_s15, %s2316_s4 }
 0x21a   : > { %p1851_p8 = scmp.lt.u32.totalorder %s1849_s24, %s1845_s14  ;;  %p1853_p11 = scmp.lt.u32.totalorder %s1845_s14, %s2227_s15 }
 0x21b   : > { %p1847_p12 = pnand %p1846_p10, %p2325_p0 }
 0x21c   : > { %p1852_p9 = por %p1851_p8, %p1850_p3 }
 0x21d   : > { %p1848_p1 = pneg %p1847_p12 }
 0x21e   : > { %p1854_p6 = por %p1853_p11, %p1852_p9 }
 0x220   : > { %p1855_p13 = pnand %p1854_p6, %p1848_p1 }
 0x222   : > { %1858 = shalt.err (!%p1855_p13)
}
 0x223   : > { %1727 = dma.vmem_to_hbm [thread:$0]  (%p2325_p0), %s2229_s9, 16, %s2227_s15, %s1365_s25   ;;  %v1133_v29 = vadd.f32 %v1132_v12, %v1057_v27  ;;  %v1207_v30 = vpop.f32.mrb[12].mxu1  ;;  %v898_v34 = vld [vmem:[%s2215_s30] sm:$0x3] }
 0x224   : > { %v1674_v32 = vpop.f32.mrb[13].mxu1  ;;  %s1551_s27 = sshll.u32 %s1937_s21, 5  ;;  %s1395_s10 = sshll.u32 %s2215_s30, 4  ;;  %s2263_s10 = int_to_ptr.vmem [resolvable:$true] %s1395_s10 }
 0x225   : > { %v1208_v31 = vadd.f32 %v1207_v30, %v1133_v29  ;;  %v1357_v35 = vpop.f32.mrb[14].mxu1  ;;  %s2261_s14 = scalar_lea.hbm %s2317_s5, %s1551_s27  ;;  %s1369_s9 = scalar_lea.sflag [#allocation7], %s2097_s29 }
 0x226   : > { %v1688_v37 = vpop.f32.mrb[15].mxu1  ;;  %s1859_s15 = scalar_lea.vmem %s2263_s10, 32  ;;  %s1954_s21 = smov [#allocation6]  }
 0x227   : > { %v1285_v33 = vadd.f32 %v1284_v0, %v1208_v31  ;;  %p1860_p2 = scmp.ne.s32.totalorder %s2263_s10, %s1859_s15  ;;  %s1863_s25 = sshll.u32 %s1954_s21, 4  ;;  %s1864_s25 = int_to_ptr.vmem [resolvable:$false] %s1863_s25 }
 0x228   : > { %s1865_s16 = scalar_lea.vmem %s1864_s25, 64  ;;  %p1866_p7 = scmp.lt.s32.totalorder %s2263_s10, %s1864_s25 }
 0x229   : > { %v1358_v36 = vadd.f32 %v1357_v35, %v1285_v33  ;;  %p1861_p5 = pnand %p1860_p2, %p2325_p0  ;;  %p1867_p10 = scmp.lt.s32.totalorder %s1865_s16, %s1859_s15 }
 0x22b   : > { %v1361_v38 = vadd.f32 %v1358_v36, %v898_v34  ;;  %p1862_p4 = pneg %p1861_p5  ;;  %p1868_p12 = por %p1867_p10, %p1866_p7 }
 0x22d   : > { %1363 = vst.msk [vmem:[%s2215_s30] sm:$0x3] %vm327_vm8, %v1361_v38  ;;  %p1869_p1 = pnand %p1868_p12, %p1862_p4 }
 0x22f   : > { %1872 = shalt.err (!%p1869_p1)
}
 0x230   : > { %s1873_s29 = scalar_lea.hbm %s2261_s14, 32  ;;  %s1877_s24 = scalar_lea.hbm %s2317_s5, 64 }
 0x231   : > { %p1874_p3 = scmp.ne.s32.totalorder %s2261_s14, %s1873_s29  ;;  %p1878_p11 = scmp.lt.u32.totalorder %s2261_s14, %s2317_s5 }
 0x232   : > { %p1879_p6 = scmp.lt.u32.totalorder %s1877_s24, %s1873_s29  ;;  %p1881_p2 = scmp.lt.u32.totalorder %s1873_s29, %s2261_s14 }
 0x233   : > { %p1875_p8 = pnand %p1874_p3, %p2325_p0 }
 0x234   : > { %p1880_p13 = por %p1879_p6, %p1878_p11 }
 0x235   : > { %p1876_p9 = pneg %p1875_p8 }
 0x236   : > { %p1882_p5 = por %p1881_p2, %p1880_p13 }
 0x238   : > { %p1883_p4 = pnand %p1882_p5, %p1876_p9 }
 0x23a   : > { %1886 = shalt.err (!%p1883_p4)
}
 0x23b   : > { %1728 = dma.vmem_to_hbm [thread:$0]  (%p2325_p0), %s2263_s10, 32, %s2261_s14, %s1369_s9  }
 0x23c PF: > { %s1407_s27 = sand.u32 1, %s1925_s18   ;;  %p2326_p7 = scmp.ne.s32.totalorder %s2322_s8, 0 }
 0x23d   : > { %p2327_p10 = scmp.ge.s32.totalorder %s1945_s23, 2  ;;  %s1408_s11 = scalar_lea.sflag [#allocation4], %s1407_s27 }
 0x23f   : > { %p1736_p12 = pnand %p2327_p10, %p2326_p7 }
 0x241   : > { %1916 = dma.done.wait (!%p1736_p12), %s1408_s11, 16  }
 0x242   : > { %1918 = vsyncadd (!%p1736_p12), %s1408_s11, 4294967280  ;;  %s1416_s28 = scalar_lea.sflag [#allocation7], %s1407_s27 }
 0x243   : > { %1920 = dma.done.wait (!%p1736_p12), %s1416_s28, 32  }
 0x244   : > { %1922 = vsyncadd (!%p1736_p12), %s1416_s28, 4294967264  ;;  %s25_s23 = sadd.s32 1, %s1945_s23   ;;  %s2328_s18 = smov %s1929_s19 }
 0x245   : > { %p22_p1 = scmp.ge.s32.totalorder %s25_s23, 4   ;;  %s2329_s19 = smov %s1933_s20 }
 0x246   : > { %s2330_s20 = smov %s2041_s7  ;;  %s2331_s21 = smov %s1941_s22 }
 0x247   : > { %s2332_s22 = smov %s2334_s26  ;;  %24 = sbr.rel (!%p22_p1) target bundleno = 8 (0x8), region = 108 }
 0x24e   :  { %1421 = vsyncpa [#allocation3], 1 }
 0x24f   :  { %1423 = vsyncpa [#allocation3 + $0x1], 1 }
 0x250   :  { %1424 = vsyncpa [#allocation4], 1 }
 0x251   :  { %1426 = vsyncpa [#allocation4 + $0x1], 1 }
 0x252   :  { %1427 = vsyncpa [#allocation7], 1 }
 0x253   :  { %1429 = vsyncpa [#allocation7 + $0x1], 1 }

</bundles_post_ra>
